<compile_context>
chip_gen: v7x
topology: tpu7x:2x2x1
jax: 0.10.0
libtpu: 0.0.40
codegen_flags: <defaults>
</compile_context>

<pallas_src>
import math
import functools

import jax
import jax.numpy as jnp
from jax.experimental import pallas as pl
from jax.experimental.pallas import tpu as pltpu

EPS = 1e-5
MATMUL_DTYPE = jnp.bfloat16          # MXU operand dtype (f32 accumulation)
VMEM_LIMIT = 32 * 1024 * 1024        # explicit scoped-VMEM budget (all chips)


# ----------------------------------------------------------------------------
# helpers
# ----------------------------------------------------------------------------
def _pick_row_block(total, target):
    """Largest divisor of `total` that is a multiple of 8 and <= target,
    else `total` (full dim always satisfies the (8,128) tiling rule)."""
    for cand in range(min(total, target), 7, -1):
        if total % cand == 0 and cand % 8 == 0:
            return cand
    return total


def _bn_scale_shift(h, gamma, beta):
    """Fold training-mode BatchNorm1d stats + affine into per-feature
    scale/shift. Plain XLA: a memory-bound reduction over (B*N, D)."""
    h2 = h.reshape(-1, h.shape[-1])
    m = jnp.mean(h2, axis=0)
    v = jnp.mean((h2 - m) ** 2, axis=0)                 # biased variance
    scale = gamma * jax.lax.rsqrt(v + EPS)
    shift = beta - m * scale
    return scale.reshape(1, -1), shift.reshape(1, -1)


# ----------------------------------------------------------------------------
# kernel A: fused (BN-apply) + multi-head attention + output proj + residual
#   x block: (1, N, D); grid over batch ("parallel")
# ----------------------------------------------------------------------------
def _attn_kernel(x_ref, scale_ref, shift_ref,
                 wq_ref, wk_ref, wv_ref, wo_ref, bo_ref,
                 o_ref, *, n_heads):
    x = x_ref[...]                                   # (bb, N, D) f32
    scale = scale_ref[...]                           # (1, D)
    shift = shift_ref[...]
    xn = x * scale[None] + shift[None]               # fused BN2 of prev layer

    bb, N, D = xn.shape
    H = n_heads
    dh = D // H
    inv = 1.0 / math.sqrt(dh)

    # Full-width projections: one D-wide contraction each (MXU stays full).
    xb = xn.astype(MATMUL_DTYPE)
    q = jnp.einsum("bnd,de->bne", xb, wq_ref[...],
                   preferred_element_type=jnp.float32)
    k = jnp.einsum("bnd,de->bne", xb, wk_ref[...],
                   preferred_element_type=jnp.float32)
    v = jnp.einsum("bnd,de->bne", xb, wv_ref[...],
                   preferred_element_type=jnp.float32)

    # Per-head attention: heads are static lane slices of the projections.
    heads = []
    for h in range(H):
        sl = slice(h * dh, (h + 1) * dh)
        qh = q[:, :, sl]
        kh = k[:, :, sl]
        vh = v[:, :, sl]
        s = jnp.einsum("bnf,bmf->bnm",
                       qh.astype(MATMUL_DTYPE), kh.astype(MATMUL_DTYPE),
                       preferred_element_type=jnp.float32) * inv
        s = s - jnp.max(s, axis=-1, keepdims=True)
        p = jnp.exp(s)
        denom = jnp.sum(p, axis=-1, keepdims=True)
        attn = p * pl.reciprocal(denom, approx=True)
        heads.append(jnp.einsum("bnm,bmf->bnf",
                                attn.astype(MATMUL_DTYPE),
                                vh.astype(MATMUL_DTYPE),
                                preferred_element_type=jnp.float32))

    # Concat heads -> single full-width output projection.
    cat = jnp.concatenate(heads, axis=-1)            # (bb, N, D) f32
    mh = jnp.einsum("bnd,de->bne", cat.astype(MATMUL_DTYPE), wo_ref[...],
                    preferred_element_type=jnp.float32)
    o_ref[...] = xn + mh + bo_ref[...][None]


def attention_block(x, scale, shift, p, n_heads):
    B, N, D = x.shape
    kernel = functools.partial(_attn_kernel, n_heads=n_heads)
    wspec = pl.BlockSpec((D, D), lambda i: (0, 0))
    vspec = pl.BlockSpec((1, D), lambda i: (0, 0))
    return pl.pallas_call(
        kernel,
        out_shape=jax.ShapeDtypeStruct((B, N, D), jnp.float32),
        grid=(B,),
        in_specs=[
            pl.BlockSpec((1, N, D), lambda i: (i, 0, 0)),
            vspec, vspec,
            wspec, wspec, wspec, wspec, vspec,
        ],
        out_specs=pl.BlockSpec((1, N, D), lambda i: (i, 0, 0)),
        compiler_params=pltpu.CompilerParams(
            dimension_semantics=("parallel",),
            vmem_limit_bytes=VMEM_LIMIT),
    )(x, scale, shift,
      p["wq"].astype(MATMUL_DTYPE), p["wk"].astype(MATMUL_DTYPE),
      p["wv"].astype(MATMUL_DTYPE), p["wo"].astype(MATMUL_DTYPE),
      p["bo"].reshape(1, D))


# ----------------------------------------------------------------------------
# kernel B: fused BN1-apply + FFN (Linear -> ReLU -> Linear) + residual
#   row block: (rb, D); grid over B*N row blocks ("parallel")
# ----------------------------------------------------------------------------
def _ffn_kernel(h_ref, scale_ref, shift_ref, w1_ref, b1_ref, w2_ref, b2_ref,
                o_ref):
    h = h_ref[...]                                   # (rb, D) f32
    hn = h * scale_ref[...] + shift_ref[...]         # fused BN1
    hb = hn.astype(MATMUL_DTYPE)
    ff = jnp.dot(hb, w1_ref[...],
                 preferred_element_type=jnp.float32) + b1_ref[...]
    ff = jnp.maximum(ff, 0.0)
    ff = jnp.dot(ff.astype(MATMUL_DTYPE), w2_ref[...],
                 preferred_element_type=jnp.float32) + b2_ref[...]
    o_ref[...] = hn + ff


def ffn_block(h, scale, shift, p):
    B, N, D = h.shape
    BN = B * N
    rb = _pick_row_block(BN, min(512, max(8, BN // 2)))
    h2 = h.reshape(BN, D)
    out = pl.pallas_call(
        _ffn_kernel,
        out_shape=jax.ShapeDtypeStruct((BN, D), jnp.float32),
        grid=(BN // rb,),
        in_specs=[
            pl.BlockSpec((rb, D), lambda i: (i, 0)),
            pl.BlockSpec((1, D), lambda i: (0, 0)),
            pl.BlockSpec((1, D), lambda i: (0, 0)),
            pl.BlockSpec((D, 4 * D), lambda i: (0, 0)),
            pl.BlockSpec((1, 4 * D), lambda i: (0, 0)),
            pl.BlockSpec((4 * D, D), lambda i: (0, 0)),
            pl.BlockSpec((1, D), lambda i: (0, 0)),
        ],
        out_specs=pl.BlockSpec((rb, D), lambda i: (i, 0)),
        compiler_params=pltpu.CompilerParams(
            dimension_semantics=("parallel",),
            vmem_limit_bytes=VMEM_LIMIT),
    )(h2, scale, shift,
      p["w1"].astype(MATMUL_DTYPE), p["b1"].reshape(1, -1),
      p["w2"].astype(MATMUL_DTYPE), p["b2"].reshape(1, -1))
    return out.reshape(B, N, D)


# ----------------------------------------------------------------------------
# encoder: init projection (plain XLA; tiny contraction dim) + layers
# ----------------------------------------------------------------------------
def mha_encoder(x, params, n_heads):
    x = x @ params["w0"] + params["b0"]              # init projection in XLA
    D = x.shape[-1]
    scale = jnp.ones((1, D), jnp.float32)
    shift = jnp.zeros((1, D), jnp.float32)
    for p in params["layers"]:
        # h1_pre = xn + MHA(xn), where xn = previous BN2 applied (identity at l=0)
        h1_pre = attention_block(x, scale, shift, p, n_heads)
        s1, t1 = _bn_scale_shift(h1_pre, p["g1"], p["be1"])
        # h2_pre = BN1(h1_pre) + FFN(BN1(h1_pre))
        h2_pre = ffn_block(h1_pre, s1, t1, p)
        scale, shift = _bn_scale_shift(h2_pre, p["g2"], p["be2"])
        x = h2_pre
    return x * scale + shift                         # final BN2 apply


# ----------------------------------------------------------------------------
# deterministic parameter init (PyTorch-Linear-style uniform bounds)
# ----------------------------------------------------------------------------
def init_params(key, n_layers, n_heads, D, input_dim):
    def lin(k, fan_in, fan_out, bias=True):
        kw, kb = jax.random.split(k)
        bound = 1.0 / math.sqrt(fan_in)
        w = jax.random.uniform(kw, (fan_in, fan_out), jnp.float32, -bound, bound)
        b = (jax.random.uniform(kb, (fan_out,), jnp.float32, -bound, bound)
             if bias else None)
        return w, b

    keys = jax.random.split(key, n_layers + 1)
    w0, b0 = lin(keys[0], input_dim, D)
    layers = []
    for l in range(n_layers):
        lk = jax.random.split(keys[l + 1], 6)
        wq, _ = lin(lk[0], D, D, bias=False)
        wk, _ = lin(lk[1], D, D, bias=False)
        wv, _ = lin(lk[2], D, D, bias=False)
        wo, bo = lin(lk[3], D, D)
        w1, b1 = lin(lk[4], D, 4 * D)
        w2, b2 = lin(lk[5], 4 * D, D)
        layers.append(dict(
            wq=wq, wk=wk, wv=wv, wo=wo, bo=bo, w1=w1, b1=b1, w2=w2, b2=b2,
            g1=jnp.ones((D,), jnp.float32), be1=jnp.zeros((D,), jnp.float32),
            g2=jnp.ones((D,), jnp.float32), be2=jnp.zeros((D,), jnp.float32)))
    return dict(w0=w0, b0=b0, layers=layers)


# ----------------------------------------------------------------------------
# pure-JAX f32 reference mirroring the PyTorch semantics (make_heads / MHA / BN)
# ----------------------------------------------------------------------------
def reference_encoder(x, params, n_heads):
    D = params["w0"].shape[1]
    x = x @ params["w0"] + params["b0"]
    for p in params["layers"]:
        B, N, _ = x.shape
        dh = D // n_heads
        heads = lambda t: t.reshape(B, N, n_heads, dh).transpose(0, 2, 1, 3)
        q, k, v = heads(x @ p["wq"]), heads(x @ p["wk"]), heads(x @ p["wv"])
        score = jnp.einsum("bhnf,bhmf->bhnm", q, k) / math.sqrt(dh)
        attn = jax.nn.softmax(score, axis=-1)
        out = jnp.einsum("bhnm,bhmf->bhnf", attn, v)
        out = out.transpose(0, 2, 1, 3).reshape(B, N, D)
        h = x + out @ p["wo"] + p["bo"]

        def bn(t, g, b):
            t2 = t.reshape(-1, D)
            m = t2.mean(0)
            var = ((t2 - m) ** 2).mean(0)
            return ((t2 - m) / jnp.sqrt(var + EPS) * g + b).reshape(t.shape)

        h = bn(h, p["g1"], p["be1"])
        ff = jnp.maximum(h @ p["w1"] + p["b1"], 0.0) @ p["w2"] + p["b2"]
        x = bn(h + ff, p["g2"], p["be2"])
    return x


if __name__ == "__main__":
    B, N, input_dim = 2, 8, 4
    n_layers, n_heads, D = 2, 4, 32

    key = jax.random.PRNGKey(0)
    kx, kp = jax.random.split(key)
    x = jax.random.normal(kx, (B, N, input_dim), jnp.float32)
    params = init_params(kp, n_layers, n_heads, D, input_dim)

    encode = jax.jit(mha_encoder, static_argnums=(2,))
    out = jax.block_until_ready(encode(x, params, n_heads))

    ref = reference_encoder(x, params, n_heads)
    assert out.shape == (B, N, D)
    # Kernel uses bf16 matmul operands (f32 accumulation) + approx reciprocal;
    # reference is pure f32, hence the bf16-appropriate tolerance.
    assert bool(jnp.allclose(out, ref, atol=5e-2, rtol=5e-2)), \
        f"max abs err = {float(jnp.max(jnp.abs(out - ref)))}"
    print("KERNEL_OK")
</pallas_src>

<mosaic_0001>
module attributes {stable_mosaic.version = 11 : i64} {
  func.func @_attn_kernel(%arg0: i32, %arg1: memref<1x8x32xf32, #tpu.memory_space<vmem>>, %arg2: memref<1x32xf32, #tpu.memory_space<vmem>>, %arg3: memref<1x32xf32, #tpu.memory_space<vmem>>, %arg4: memref<32x32xbf16, #tpu.memory_space<vmem>>, %arg5: memref<32x32xbf16, #tpu.memory_space<vmem>>, %arg6: memref<32x32xbf16, #tpu.memory_space<vmem>>, %arg7: memref<32x32xbf16, #tpu.memory_space<vmem>>, %arg8: memref<1x32xf32, #tpu.memory_space<vmem>>, %arg9: memref<1x8x32xf32, #tpu.memory_space<vmem>>) attributes {dimension_semantics = [#tpu.dimension_semantics<parallel>], iteration_bounds = array<i64: 2>, scalar_prefetch = 0 : i64, scratch_operands = 0 : i64, tpu.core_type = #tpu.core_type<tc>, window_params = [{transform_indices = @transform_0, window_bounds = array<i64: 1, 8, 32>}, {pipeline_mode = #tpu.pipeline_mode<synchronous>, transform_indices = @transform_1, window_bounds = array<i64: 1, 32>}, {pipeline_mode = #tpu.pipeline_mode<synchronous>, transform_indices = @transform_2, window_bounds = array<i64: 1, 32>}, {pipeline_mode = #tpu.pipeline_mode<synchronous>, transform_indices = @transform_3, window_bounds = array<i64: 32, 32>}, {pipeline_mode = #tpu.pipeline_mode<synchronous>, transform_indices = @transform_4, window_bounds = array<i64: 32, 32>}, {pipeline_mode = #tpu.pipeline_mode<synchronous>, transform_indices = @transform_5, window_bounds = array<i64: 32, 32>}, {pipeline_mode = #tpu.pipeline_mode<synchronous>, transform_indices = @transform_6, window_bounds = array<i64: 32, 32>}, {pipeline_mode = #tpu.pipeline_mode<synchronous>, transform_indices = @transform_7, window_bounds = array<i64: 1, 32>}, {transform_indices = @transform_8, window_bounds = array<i64: 1, 8, 32>}]} {
    %c0 = arith.constant 0 : index
    %c0_0 = arith.constant 0 : index
    %c0_1 = arith.constant 0 : index
    %0 = vector.load %arg1[%c0, %c0_0, %c0_1] : memref<1x8x32xf32, #tpu.memory_space<vmem>>, vector<1x8x32xf32>
    %c0_2 = arith.constant 0 : index
    %c0_3 = arith.constant 0 : index
    %1 = vector.load %arg2[%c0_2, %c0_3] : memref<1x32xf32, #tpu.memory_space<vmem>>, vector<1x32xf32>
    %c0_4 = arith.constant 0 : index
    %c0_5 = arith.constant 0 : index
    %2 = vector.load %arg3[%c0_4, %c0_5] : memref<1x32xf32, #tpu.memory_space<vmem>>, vector<1x32xf32>
    %3 = vector.shape_cast %1 : vector<1x32xf32> to vector<1x1x32xf32>
    %4 = vector.broadcast %3 : vector<1x1x32xf32> to vector<1x8x32xf32>
    %5 = arith.mulf %0, %4 : vector<1x8x32xf32>
    %6 = vector.shape_cast %2 : vector<1x32xf32> to vector<1x1x32xf32>
    %7 = vector.broadcast %6 : vector<1x1x32xf32> to vector<1x8x32xf32>
    %8 = arith.addf %5, %7 : vector<1x8x32xf32>
    %9 = arith.truncf %8 : vector<1x8x32xf32> to vector<1x8x32xbf16>
    %c0_6 = arith.constant 0 : index
    %c0_7 = arith.constant 0 : index
    %10 = vector.load %arg4[%c0_6, %c0_7] : memref<32x32xbf16, #tpu.memory_space<vmem>>, vector<32x32xbf16>
    "tpu.trace_start"() <{level = 10 : i32, message = "bnd,de->bne"}> : () -> ()
    %cst = arith.constant dense<0.000000e+00> : vector<1x8x32xf32>
    %11 = tpu.matmul %9, %10, %cst {dimension_numbers = #tpu.dot_dimension_numbers<[2], [0], [0, 1], [1], [0, 0, 0, 1, 1, 1], [], []>} : vector<1x8x32xbf16>, vector<32x32xbf16>, vector<1x8x32xf32> -> vector<1x8x32xf32>
    "tpu.trace_stop"() : () -> ()
    %c0_8 = arith.constant 0 : index
    %c0_9 = arith.constant 0 : index
    %12 = vector.load %arg5[%c0_8, %c0_9] : memref<32x32xbf16, #tpu.memory_space<vmem>>, vector<32x32xbf16>
    "tpu.trace_start"() <{level = 10 : i32, message = "bnd,de->bne"}> : () -> ()
    %cst_10 = arith.constant dense<0.000000e+00> : vector<1x8x32xf32>
    %13 = tpu.matmul %9, %12, %cst_10 {dimension_numbers = #tpu.dot_dimension_numbers<[2], [0], [0, 1], [1], [0, 0, 0, 1, 1, 1], [], []>} : vector<1x8x32xbf16>, vector<32x32xbf16>, vector<1x8x32xf32> -> vector<1x8x32xf32>
    "tpu.trace_stop"() : () -> ()
    %c0_11 = arith.constant 0 : index
    %c0_12 = arith.constant 0 : index
    %14 = vector.load %arg6[%c0_11, %c0_12] : memref<32x32xbf16, #tpu.memory_space<vmem>>, vector<32x32xbf16>
    "tpu.trace_start"() <{level = 10 : i32, message = "bnd,de->bne"}> : () -> ()
    %cst_13 = arith.constant dense<0.000000e+00> : vector<1x8x32xf32>
    %15 = tpu.matmul %9, %14, %cst_13 {dimension_numbers = #tpu.dot_dimension_numbers<[2], [0], [0, 1], [1], [0, 0, 0, 1, 1, 1], [], []>} : vector<1x8x32xbf16>, vector<32x32xbf16>, vector<1x8x32xf32> -> vector<1x8x32xf32>
    "tpu.trace_stop"() : () -> ()
    %16 = vector.extract_strided_slice %11 {offsets = [0, 0, 0], sizes = [1, 8, 8], strides = [1, 1, 1]} : vector<1x8x32xf32> to vector<1x8x8xf32>
    %17 = vector.extract_strided_slice %13 {offsets = [0, 0, 0], sizes = [1, 8, 8], strides = [1, 1, 1]} : vector<1x8x32xf32> to vector<1x8x8xf32>
    %18 = vector.extract_strided_slice %15 {offsets = [0, 0, 0], sizes = [1, 8, 8], strides = [1, 1, 1]} : vector<1x8x32xf32> to vector<1x8x8xf32>
    %19 = arith.truncf %16 : vector<1x8x8xf32> to vector<1x8x8xbf16>
    %20 = arith.truncf %17 : vector<1x8x8xf32> to vector<1x8x8xbf16>
    "tpu.trace_start"() <{level = 10 : i32, message = "bnf,bmf->bnm"}> : () -> ()
    %cst_14 = arith.constant dense<0.000000e+00> : vector<1x8x8xf32>
    %21 = tpu.matmul %19, %20, %cst_14 {dimension_numbers = #tpu.dot_dimension_numbers<[2], [2], [1], [1], [0, 0, 0, 1, 1, 1], [0], [0]>} : vector<1x8x8xbf16>, vector<1x8x8xbf16>, vector<1x8x8xf32> -> vector<1x8x8xf32>
    "tpu.trace_stop"() : () -> ()
    %cst_15 = arith.constant 0.353553385 : f32
    %22 = vector.broadcast %cst_15 : f32 to vector<1x8x8xf32>
    %23 = arith.mulf %21, %22 : vector<1x8x8xf32>
    %cst_16 = arith.constant dense<0xFF800000> : vector<1x8xf32>
    %24 = vector.multi_reduction <maximumf>, %23, %cst_16 [2] : vector<1x8x8xf32> to vector<1x8xf32>
    %25 = vector.shape_cast %24 : vector<1x8xf32> to vector<1x8x1xf32>
    %26 = vector.broadcast %25 : vector<1x8x1xf32> to vector<1x8x8xf32>
    %27 = arith.subf %23, %26 : vector<1x8x8xf32>
    %28 = math.exp %27 : vector<1x8x8xf32>
    %cst_17 = arith.constant dense<0.000000e+00> : vector<1x8xf32>
    %29 = vector.multi_reduction <add>, %28, %cst_17 [2] : vector<1x8x8xf32> to vector<1x8xf32>
    %30 = vector.shape_cast %29 : vector<1x8xf32> to vector<1x8x1xf32>
    %31 = tpu.reciprocal %30 {approx = true} : vector<1x8x1xf32> -> vector<1x8x1xf32>
    %32 = vector.broadcast %31 : vector<1x8x1xf32> to vector<1x8x8xf32>
    %33 = arith.mulf %28, %32 : vector<1x8x8xf32>
    %34 = arith.truncf %33 : vector<1x8x8xf32> to vector<1x8x8xbf16>
    %35 = arith.truncf %18 : vector<1x8x8xf32> to vector<1x8x8xbf16>
    "tpu.trace_start"() <{level = 10 : i32, message = "bnm,bmf->bnf"}> : () -> ()
    %cst_18 = arith.constant dense<0.000000e+00> : vector<1x8x8xf32>
    %36 = tpu.matmul %34, %35, %cst_18 {dimension_numbers = #tpu.dot_dimension_numbers<[2], [1], [1], [2], [0, 0, 0, 1, 1, 2], [0], [0]>} : vector<1x8x8xbf16>, vector<1x8x8xbf16>, vector<1x8x8xf32> -> vector<1x8x8xf32>
    "tpu.trace_stop"() : () -> ()
    %37 = vector.extract_strided_slice %11 {offsets = [0, 0, 8], sizes = [1, 8, 8], strides = [1, 1, 1]} : vector<1x8x32xf32> to vector<1x8x8xf32>
    %38 = vector.extract_strided_slice %13 {offsets = [0, 0, 8], sizes = [1, 8, 8], strides = [1, 1, 1]} : vector<1x8x32xf32> to vector<1x8x8xf32>
    %39 = vector.extract_strided_slice %15 {offsets = [0, 0, 8], sizes = [1, 8, 8], strides = [1, 1, 1]} : vector<1x8x32xf32> to vector<1x8x8xf32>
    %40 = arith.truncf %37 : vector<1x8x8xf32> to vector<1x8x8xbf16>
    %41 = arith.truncf %38 : vector<1x8x8xf32> to vector<1x8x8xbf16>
    "tpu.trace_start"() <{level = 10 : i32, message = "bnf,bmf->bnm"}> : () -> ()
    %cst_19 = arith.constant dense<0.000000e+00> : vector<1x8x8xf32>
    %42 = tpu.matmul %40, %41, %cst_19 {dimension_numbers = #tpu.dot_dimension_numbers<[2], [2], [1], [1], [0, 0, 0, 1, 1, 1], [0], [0]>} : vector<1x8x8xbf16>, vector<1x8x8xbf16>, vector<1x8x8xf32> -> vector<1x8x8xf32>
    "tpu.trace_stop"() : () -> ()
    %cst_20 = arith.constant 0.353553385 : f32
    %43 = vector.broadcast %cst_20 : f32 to vector<1x8x8xf32>
    %44 = arith.mulf %42, %43 : vector<1x8x8xf32>
    %cst_21 = arith.constant dense<0xFF800000> : vector<1x8xf32>
    %45 = vector.multi_reduction <maximumf>, %44, %cst_21 [2] : vector<1x8x8xf32> to vector<1x8xf32>
    %46 = vector.shape_cast %45 : vector<1x8xf32> to vector<1x8x1xf32>
    %47 = vector.broadcast %46 : vector<1x8x1xf32> to vector<1x8x8xf32>
    %48 = arith.subf %44, %47 : vector<1x8x8xf32>
    %49 = math.exp %48 : vector<1x8x8xf32>
    %cst_22 = arith.constant dense<0.000000e+00> : vector<1x8xf32>
    %50 = vector.multi_reduction <add>, %49, %cst_22 [2] : vector<1x8x8xf32> to vector<1x8xf32>
    %51 = vector.shape_cast %50 : vector<1x8xf32> to vector<1x8x1xf32>
    %52 = tpu.reciprocal %51 {approx = true} : vector<1x8x1xf32> -> vector<1x8x1xf32>
    %53 = vector.broadcast %52 : vector<1x8x1xf32> to vector<1x8x8xf32>
    %54 = arith.mulf %49, %53 : vector<1x8x8xf32>
    %55 = arith.truncf %54 : vector<1x8x8xf32> to vector<1x8x8xbf16>
    %56 = arith.truncf %39 : vector<1x8x8xf32> to vector<1x8x8xbf16>
    "tpu.trace_start"() <{level = 10 : i32, message = "bnm,bmf->bnf"}> : () -> ()
    %cst_23 = arith.constant dense<0.000000e+00> : vector<1x8x8xf32>
    %57 = tpu.matmul %55, %56, %cst_23 {dimension_numbers = #tpu.dot_dimension_numbers<[2], [1], [1], [2], [0, 0, 0, 1, 1, 2], [0], [0]>} : vector<1x8x8xbf16>, vector<1x8x8xbf16>, vector<1x8x8xf32> -> vector<1x8x8xf32>
    "tpu.trace_stop"() : () -> ()
    %58 = vector.extract_strided_slice %11 {offsets = [0, 0, 16], sizes = [1, 8, 8], strides = [1, 1, 1]} : vector<1x8x32xf32> to vector<1x8x8xf32>
    %59 = vector.extract_strided_slice %13 {offsets = [0, 0, 16], sizes = [1, 8, 8], strides = [1, 1, 1]} : vector<1x8x32xf32> to vector<1x8x8xf32>
    %60 = vector.extract_strided_slice %15 {offsets = [0, 0, 16], sizes = [1, 8, 8], strides = [1, 1, 1]} : vector<1x8x32xf32> to vector<1x8x8xf32>
    %61 = arith.truncf %58 : vector<1x8x8xf32> to vector<1x8x8xbf16>
    %62 = arith.truncf %59 : vector<1x8x8xf32> to vector<1x8x8xbf16>
    "tpu.trace_start"() <{level = 10 : i32, message = "bnf,bmf->bnm"}> : () -> ()
    %cst_24 = arith.constant dense<0.000000e+00> : vector<1x8x8xf32>
    %63 = tpu.matmul %61, %62, %cst_24 {dimension_numbers = #tpu.dot_dimension_numbers<[2], [2], [1], [1], [0, 0, 0, 1, 1, 1], [0], [0]>} : vector<1x8x8xbf16>, vector<1x8x8xbf16>, vector<1x8x8xf32> -> vector<1x8x8xf32>
    "tpu.trace_stop"() : () -> ()
    %cst_25 = arith.constant 0.353553385 : f32
    %64 = vector.broadcast %cst_25 : f32 to vector<1x8x8xf32>
    %65 = arith.mulf %63, %64 : vector<1x8x8xf32>
    %cst_26 = arith.constant dense<0xFF800000> : vector<1x8xf32>
    %66 = vector.multi_reduction <maximumf>, %65, %cst_26 [2] : vector<1x8x8xf32> to vector<1x8xf32>
    %67 = vector.shape_cast %66 : vector<1x8xf32> to vector<1x8x1xf32>
    %68 = vector.broadcast %67 : vector<1x8x1xf32> to vector<1x8x8xf32>
    %69 = arith.subf %65, %68 : vector<1x8x8xf32>
    %70 = math.exp %69 : vector<1x8x8xf32>
    %cst_27 = arith.constant dense<0.000000e+00> : vector<1x8xf32>
    %71 = vector.multi_reduction <add>, %70, %cst_27 [2] : vector<1x8x8xf32> to vector<1x8xf32>
    %72 = vector.shape_cast %71 : vector<1x8xf32> to vector<1x8x1xf32>
    %73 = tpu.reciprocal %72 {approx = true} : vector<1x8x1xf32> -> vector<1x8x1xf32>
    %74 = vector.broadcast %73 : vector<1x8x1xf32> to vector<1x8x8xf32>
    %75 = arith.mulf %70, %74 : vector<1x8x8xf32>
    %76 = arith.truncf %75 : vector<1x8x8xf32> to vector<1x8x8xbf16>
    %77 = arith.truncf %60 : vector<1x8x8xf32> to vector<1x8x8xbf16>
    "tpu.trace_start"() <{level = 10 : i32, message = "bnm,bmf->bnf"}> : () -> ()
    %cst_28 = arith.constant dense<0.000000e+00> : vector<1x8x8xf32>
    %78 = tpu.matmul %76, %77, %cst_28 {dimension_numbers = #tpu.dot_dimension_numbers<[2], [1], [1], [2], [0, 0, 0, 1, 1, 2], [0], [0]>} : vector<1x8x8xbf16>, vector<1x8x8xbf16>, vector<1x8x8xf32> -> vector<1x8x8xf32>
    "tpu.trace_stop"() : () -> ()
    %79 = vector.extract_strided_slice %11 {offsets = [0, 0, 24], sizes = [1, 8, 8], strides = [1, 1, 1]} : vector<1x8x32xf32> to vector<1x8x8xf32>
    %80 = vector.extract_strided_slice %13 {offsets = [0, 0, 24], sizes = [1, 8, 8], strides = [1, 1, 1]} : vector<1x8x32xf32> to vector<1x8x8xf32>
    %81 = vector.extract_strided_slice %15 {offsets = [0, 0, 24], sizes = [1, 8, 8], strides = [1, 1, 1]} : vector<1x8x32xf32> to vector<1x8x8xf32>
    %82 = arith.truncf %79 : vector<1x8x8xf32> to vector<1x8x8xbf16>
    %83 = arith.truncf %80 : vector<1x8x8xf32> to vector<1x8x8xbf16>
    "tpu.trace_start"() <{level = 10 : i32, message = "bnf,bmf->bnm"}> : () -> ()
    %cst_29 = arith.constant dense<0.000000e+00> : vector<1x8x8xf32>
    %84 = tpu.matmul %82, %83, %cst_29 {dimension_numbers = #tpu.dot_dimension_numbers<[2], [2], [1], [1], [0, 0, 0, 1, 1, 1], [0], [0]>} : vector<1x8x8xbf16>, vector<1x8x8xbf16>, vector<1x8x8xf32> -> vector<1x8x8xf32>
    "tpu.trace_stop"() : () -> ()
    %cst_30 = arith.constant 0.353553385 : f32
    %85 = vector.broadcast %cst_30 : f32 to vector<1x8x8xf32>
    %86 = arith.mulf %84, %85 : vector<1x8x8xf32>
    %cst_31 = arith.constant dense<0xFF800000> : vector<1x8xf32>
    %87 = vector.multi_reduction <maximumf>, %86, %cst_31 [2] : vector<1x8x8xf32> to vector<1x8xf32>
    %88 = vector.shape_cast %87 : vector<1x8xf32> to vector<1x8x1xf32>
    %89 = vector.broadcast %88 : vector<1x8x1xf32> to vector<1x8x8xf32>
    %90 = arith.subf %86, %89 : vector<1x8x8xf32>
    %91 = math.exp %90 : vector<1x8x8xf32>
    %cst_32 = arith.constant dense<0.000000e+00> : vector<1x8xf32>
    %92 = vector.multi_reduction <add>, %91, %cst_32 [2] : vector<1x8x8xf32> to vector<1x8xf32>
    %93 = vector.shape_cast %92 : vector<1x8xf32> to vector<1x8x1xf32>
    %94 = tpu.reciprocal %93 {approx = true} : vector<1x8x1xf32> -> vector<1x8x1xf32>
    %95 = vector.broadcast %94 : vector<1x8x1xf32> to vector<1x8x8xf32>
    %96 = arith.mulf %91, %95 : vector<1x8x8xf32>
    %97 = arith.truncf %96 : vector<1x8x8xf32> to vector<1x8x8xbf16>
    %98 = arith.truncf %81 : vector<1x8x8xf32> to vector<1x8x8xbf16>
    "tpu.trace_start"() <{level = 10 : i32, message = "bnm,bmf->bnf"}> : () -> ()
    %cst_33 = arith.constant dense<0.000000e+00> : vector<1x8x8xf32>
    %99 = tpu.matmul %97, %98, %cst_33 {dimension_numbers = #tpu.dot_dimension_numbers<[2], [1], [1], [2], [0, 0, 0, 1, 1, 2], [0], [0]>} : vector<1x8x8xbf16>, vector<1x8x8xbf16>, vector<1x8x8xf32> -> vector<1x8x8xf32>
    "tpu.trace_stop"() : () -> ()
    %100 = tpu.concatenate %36, %57, %78, %99 in 2 : vector<1x8x8xf32>, vector<1x8x8xf32>, vector<1x8x8xf32>, vector<1x8x8xf32> -> vector<1x8x32xf32>
    %101 = arith.truncf %100 : vector<1x8x32xf32> to vector<1x8x32xbf16>
    %c0_34 = arith.constant 0 : index
    %c0_35 = arith.constant 0 : index
    %102 = vector.load %arg7[%c0_34, %c0_35] : memref<32x32xbf16, #tpu.memory_space<vmem>>, vector<32x32xbf16>
    "tpu.trace_start"() <{level = 10 : i32, message = "bnd,de->bne"}> : () -> ()
    %cst_36 = arith.constant dense<0.000000e+00> : vector<1x8x32xf32>
    %103 = tpu.matmul %101, %102, %cst_36 {dimension_numbers = #tpu.dot_dimension_numbers<[2], [0], [0, 1], [1], [0, 0, 0, 1, 1, 1], [], []>} : vector<1x8x32xbf16>, vector<32x32xbf16>, vector<1x8x32xf32> -> vector<1x8x32xf32>
    "tpu.trace_stop"() : () -> ()
    %104 = arith.addf %8, %103 : vector<1x8x32xf32>
    %c0_37 = arith.constant 0 : index
    %c0_38 = arith.constant 0 : index
    %105 = vector.load %arg8[%c0_37, %c0_38] : memref<1x32xf32, #tpu.memory_space<vmem>>, vector<1x32xf32>
    %106 = vector.shape_cast %105 : vector<1x32xf32> to vector<1x1x32xf32>
    %107 = vector.broadcast %106 : vector<1x1x32xf32> to vector<1x8x32xf32>
    %108 = arith.addf %104, %107 : vector<1x8x32xf32>
    %c0_39 = arith.constant 0 : index
    %c0_40 = arith.constant 0 : index
    %c0_41 = arith.constant 0 : index
    %109 = vector.load %arg9[%c0_39, %c0_40, %c0_41] : memref<1x8x32xf32, #tpu.memory_space<vmem>>, vector<1x8x32xf32>
    tpu.vector_store %arg9[%c0_39, %c0_40, %c0_41], %108 {strides = array<i32>} : memref<1x8x32xf32, #tpu.memory_space<vmem>>, vector<1x8x32xf32>,
    return
  }
  func.func @transform_0(%arg0: i32) -> (i32, i32, i32) {
    %c0_i32 = arith.constant 0 : i32
    %c0_i32_0 = arith.constant 0 : i32
    %c0_i32_1 = arith.constant 0 : i32
    return %arg0, %c0_i32, %c0_i32_0 : i32, i32, i32
  }
  func.func @transform_1(%arg0: i32) -> (i32, i32) {
    %c0_i32 = arith.constant 0 : i32
    %c0_i32_0 = arith.constant 0 : i32
    %c0_i32_1 = arith.constant 0 : i32
    return %c0_i32, %c0_i32_0 : i32, i32
  }
  func.func @transform_2(%arg0: i32) -> (i32, i32) {
    %c0_i32 = arith.constant 0 : i32
    %c0_i32_0 = arith.constant 0 : i32
    %c0_i32_1 = arith.constant 0 : i32
    return %c0_i32, %c0_i32_0 : i32, i32
  }
  func.func @transform_3(%arg0: i32) -> (i32, i32) {
    %c0_i32 = arith.constant 0 : i32
    %c0_i32_0 = arith.constant 0 : i32
    %c0_i32_1 = arith.constant 0 : i32
    return %c0_i32, %c0_i32_0 : i32, i32
  }
  func.func @transform_4(%arg0: i32) -> (i32, i32) {
    %c0_i32 = arith.constant 0 : i32
    %c0_i32_0 = arith.constant 0 : i32
    %c0_i32_1 = arith.constant 0 : i32
    return %c0_i32, %c0_i32_0 : i32, i32
  }
  func.func @transform_5(%arg0: i32) -> (i32, i32) {
    %c0_i32 = arith.constant 0 : i32
    %c0_i32_0 = arith.constant 0 : i32
    %c0_i32_1 = arith.constant 0 : i32
    return %c0_i32, %c0_i32_0 : i32, i32
  }
  func.func @transform_6(%arg0: i32) -> (i32, i32) {
    %c0_i32 = arith.constant 0 : i32
    %c0_i32_0 = arith.constant 0 : i32
    %c0_i32_1 = arith.constant 0 : i32
    return %c0_i32, %c0_i32_0 : i32, i32
  }
  func.func @transform_7(%arg0: i32) -> (i32, i32) {
    %c0_i32 = arith.constant 0 : i32
    %c0_i32_0 = arith.constant 0 : i32
    %c0_i32_1 = arith.constant 0 : i32
    return %c0_i32, %c0_i32_0 : i32, i32
  }
  func.func @transform_8(%arg0: i32) -> (i32, i32, i32) {
    %c0_i32 = arith.constant 0 : i32
    %c0_i32_0 = arith.constant 0 : i32
    %c0_i32_1 = arith.constant 0 : i32
    return %arg0, %c0_i32, %c0_i32_0 : i32, i32, i32
  }
}

module attributes {stable_mosaic.version = 11 : i64} {
  func.func @_ffn_kernel(%arg0: i32, %arg1: memref<8x32xf32, #tpu.memory_space<vmem>>, %arg2: memref<1x32xf32, #tpu.memory_space<vmem>>, %arg3: memref<1x32xf32, #tpu.memory_space<vmem>>, %arg4: memref<32x128xbf16, #tpu.memory_space<vmem>>, %arg5: memref<1x128xf32, #tpu.memory_space<vmem>>, %arg6: memref<128x32xbf16, #tpu.memory_space<vmem>>, %arg7: memref<1x32xf32, #tpu.memory_space<vmem>>, %arg8: memref<8x32xf32, #tpu.memory_space<vmem>>) attributes {dimension_semantics = [#tpu.dimension_semantics<parallel>], iteration_bounds = array<i64: 2>, scalar_prefetch = 0 : i64, scratch_operands = 0 : i64, tpu.core_type = #tpu.core_type<tc>, window_params = [{transform_indices = @transform_0, window_bounds = array<i64: 8, 32>}, {pipeline_mode = #tpu.pipeline_mode<synchronous>, transform_indices = @transform_1, window_bounds = array<i64: 1, 32>}, {pipeline_mode = #tpu.pipeline_mode<synchronous>, transform_indices = @transform_2, window_bounds = array<i64: 1, 32>}, {pipeline_mode = #tpu.pipeline_mode<synchronous>, transform_indices = @transform_3, window_bounds = array<i64: 32, 128>}, {pipeline_mode = #tpu.pipeline_mode<synchronous>, transform_indices = @transform_4, window_bounds = array<i64: 1, 128>}, {pipeline_mode = #tpu.pipeline_mode<synchronous>, transform_indices = @transform_5, window_bounds = array<i64: 128, 32>}, {pipeline_mode = #tpu.pipeline_mode<synchronous>, transform_indices = @transform_6, window_bounds = array<i64: 1, 32>}, {transform_indices = @transform_7, window_bounds = array<i64: 8, 32>}]} {
    %c0 = arith.constant 0 : index
    %c0_0 = arith.constant 0 : index
    %0 = vector.load %arg1[%c0, %c0_0] : memref<8x32xf32, #tpu.memory_space<vmem>>, vector<8x32xf32>
    %c0_1 = arith.constant 0 : index
    %c0_2 = arith.constant 0 : index
    %1 = vector.load %arg2[%c0_1, %c0_2] : memref<1x32xf32, #tpu.memory_space<vmem>>, vector<1x32xf32>
    %2 = vector.broadcast %1 : vector<1x32xf32> to vector<8x32xf32>
    %3 = arith.mulf %0, %2 : vector<8x32xf32>
    %c0_3 = arith.constant 0 : index
    %c0_4 = arith.constant 0 : index
    %4 = vector.load %arg3[%c0_3, %c0_4] : memref<1x32xf32, #tpu.memory_space<vmem>>, vector<1x32xf32>
    %5 = vector.broadcast %4 : vector<1x32xf32> to vector<8x32xf32>
    %6 = arith.addf %3, %5 : vector<8x32xf32>
    %7 = arith.truncf %6 : vector<8x32xf32> to vector<8x32xbf16>
    %c0_5 = arith.constant 0 : index
    %c0_6 = arith.constant 0 : index
    %8 = vector.load %arg4[%c0_5, %c0_6] : memref<32x128xbf16, #tpu.memory_space<vmem>>, vector<32x128xbf16>
    %cst = arith.constant dense<0.000000e+00> : vector<8x128xf32>
    %9 = tpu.matmul %7, %8, %cst {dimension_numbers = #tpu.dot_dimension_numbers<[1], [0], [0], [1], [0, 0, 1, 1], [], []>} : vector<8x32xbf16>, vector<32x128xbf16>, vector<8x128xf32> -> vector<8x128xf32>
    %c0_7 = arith.constant 0 : index
    %c0_8 = arith.constant 0 : index
    %10 = vector.load %arg5[%c0_7, %c0_8] : memref<1x128xf32, #tpu.memory_space<vmem>>, vector<1x128xf32>
    %11 = vector.broadcast %10 : vector<1x128xf32> to vector<8x128xf32>
    %12 = arith.addf %9, %11 : vector<8x128xf32>
    %cst_9 = arith.constant 0.000000e+00 : f32
    %13 = vector.broadcast %cst_9 : f32 to vector<8x128xf32>
    %14 = arith.maximumf %12, %13 : vector<8x128xf32>
    %15 = arith.truncf %14 : vector<8x128xf32> to vector<8x128xbf16>
    %c0_10 = arith.constant 0 : index
    %c0_11 = arith.constant 0 : index
    %16 = vector.load %arg6[%c0_10, %c0_11] : memref<128x32xbf16, #tpu.memory_space<vmem>>, vector<128x32xbf16>
    %cst_12 = arith.constant dense<0.000000e+00> : vector<8x32xf32>
    %17 = tpu.matmul %15, %16, %cst_12 {dimension_numbers = #tpu.dot_dimension_numbers<[1], [0], [0], [1], [0, 0, 1, 1], [], []>} : vector<8x128xbf16>, vector<128x32xbf16>, vector<8x32xf32> -> vector<8x32xf32>
    %c0_13 = arith.constant 0 : index
    %c0_14 = arith.constant 0 : index
    %18 = vector.load %arg7[%c0_13, %c0_14] : memref<1x32xf32, #tpu.memory_space<vmem>>, vector<1x32xf32>
    %19 = vector.broadcast %18 : vector<1x32xf32> to vector<8x32xf32>
    %20 = arith.addf %17, %19 : vector<8x32xf32>
    %21 = arith.addf %6, %20 : vector<8x32xf32>
    %c0_15 = arith.constant 0 : index
    %c0_16 = arith.constant 0 : index
    %22 = vector.load %arg8[%c0_15, %c0_16] : memref<8x32xf32, #tpu.memory_space<vmem>>, vector<8x32xf32>
    tpu.vector_store %arg8[%c0_15, %c0_16], %21 {strides = array<i32>} : memref<8x32xf32, #tpu.memory_space<vmem>>, vector<8x32xf32>,
    return
  }
  func.func @transform_0(%arg0: i32) -> (i32, i32) {
    %c0_i32 = arith.constant 0 : i32
    %c0_i32_0 = arith.constant 0 : i32
    return %arg0, %c0_i32 : i32, i32
  }
  func.func @transform_1(%arg0: i32) -> (i32, i32) {
    %c0_i32 = arith.constant 0 : i32
    %c0_i32_0 = arith.constant 0 : i32
    %c0_i32_1 = arith.constant 0 : i32
    return %c0_i32, %c0_i32_0 : i32, i32
  }
  func.func @transform_2(%arg0: i32) -> (i32, i32) {
    %c0_i32 = arith.constant 0 : i32
    %c0_i32_0 = arith.constant 0 : i32
    %c0_i32_1 = arith.constant 0 : i32
    return %c0_i32, %c0_i32_0 : i32, i32
  }
  func.func @transform_3(%arg0: i32) -> (i32, i32) {
    %c0_i32 = arith.constant 0 : i32
    %c0_i32_0 = arith.constant 0 : i32
    %c0_i32_1 = arith.constant 0 : i32
    return %c0_i32, %c0_i32_0 : i32, i32
  }
  func.func @transform_4(%arg0: i32) -> (i32, i32) {
    %c0_i32 = arith.constant 0 : i32
    %c0_i32_0 = arith.constant 0 : i32
    %c0_i32_1 = arith.constant 0 : i32
    return %c0_i32, %c0_i32_0 : i32, i32
  }
  func.func @transform_5(%arg0: i32) -> (i32, i32) {
    %c0_i32 = arith.constant 0 : i32
    %c0_i32_0 = arith.constant 0 : i32
    %c0_i32_1 = arith.constant 0 : i32
    return %c0_i32, %c0_i32_0 : i32, i32
  }
  func.func @transform_6(%arg0: i32) -> (i32, i32) {
    %c0_i32 = arith.constant 0 : i32
    %c0_i32_0 = arith.constant 0 : i32
    %c0_i32_1 = arith.constant 0 : i32
    return %c0_i32, %c0_i32_0 : i32, i32
  }
  func.func @transform_7(%arg0: i32) -> (i32, i32) {
    %c0_i32 = arith.constant 0 : i32
    %c0_i32_0 = arith.constant 0 : i32
    return %arg0, %c0_i32 : i32, i32
  }
}

</mosaic_0001>

<bundles_post_ra>
// kernel: mha_encoder.5
= control target key start
LH: loop header
LB: loop body
LE: loop exit
PB: predicated region body
PF: predicated region fallthrough
CT: control target
= control target key end

     0   :  { %s662_s24 = smov 0   ;;  %s730_s0 = inlined_call_operand.vmem [shape: f32[16,32], index: 0, kind: input, shape index: {}]   ;;  %s731_s1 = inlined_call_operand.vmem [shape: f32[1,32], index: 1, kind: input, shape index: {}]   ;;  %s732_s2 = inlined_call_operand.vmem [shape: f32[1,32], index: 2, kind: input, shape index: {}]   ;;  %s733_s3 = inlined_call_operand.vmem [shape: bf16[32,128], index: 3, kind: input, shape index: {}]   ;;  %s734_s4 = inlined_call_operand.vmem [shape: f32[1,128], index: 4, kind: input, shape index: {}]   ;;  %s735_s5 = inlined_call_operand.vmem [shape: bf16[128,32], index: 5, kind: input, shape index: {}]   ;;  %s736_s6 = inlined_call_operand.vmem [shape: f32[1,32], index: 6, kind: input, shape index: {}]   ;;  %s737_s7 = inlined_call_operand.vmem [shape: f32[16,32], index: 7, kind: output, shape index: {}]  }
   0x1 LB: > { %s528_s25 = sadd.s32 4294967295, %s618_s24   ;;  %p532_p0 = scmp.ge.s32.totalorder %s618_s24, 1  ;;  %s618_s24 = sphi %s662_s24, %s17_s24  }
   0x2   : > { %p236_p1 = scmp.lt.s32.totalorder %s618_s24, 3 }
   0x4   : > { %p237_p2 = pnand %p532_p0, %p236_p1 }
   0x5   : > { %v602_v0 = vld [vmem:[%s733_s3] sm:$0xff] (!%p237_p2)   ;;  %v620_v1 = vmov (!%p237_p2), 0.0   ;;  %v603_v2 = vld [vmem:[%s733_s3 + $0x8] sm:$0xff] (!%p237_p2)   ;;  %vm621_vm0 = vmmov (!%p237_p2), 0   ;;  %p266_p3 = scmp.lt.s32.totalorder (!%p237_p2), %s528_s25, 1  ;;  %v606_v9 = vld [vmem:[%s735_s5 + $0x10] sm:$0xff] (!%p237_p2)  }
   0x6   : > { %240 = sbr.rel (%p237_p2) target bundleno = 458 (0x1ca), region = 48  ;;  %564 = vmatprep.subr.bf16.mxu0 (!%p237_p2), %v620_v1  ;;  %572 = vmatprep.subr.bf16.mxu1 (!%p237_p2), %v620_v1  ;;  %v604_v3 = vld [vmem:[%s735_s5] sm:$0xff] (!%p237_p2)   ;;  %v605_v5 = vld [vmem:[%s735_s5 + $0x8] sm:$0xff] (!%p237_p2)   ;;  %vm316_vm1 = vcmask (!%p237_p2), 261120   ;;  %v607_v12 = vld [vmem:[%s735_s5 + $0x18] sm:$0xff] (!%p237_p2)  }
   0x7   : > { %565 = vmatpush3.bf16.msra.mxu0 (!%p237_p2), %v602_v0  ;;  %568 = vmatprep.mubr.msk.bf16.mxu0 (!%p237_p2), %vm621_vm0, %v620_v1  ;;  %v535_v4 = vld [vmem:[%s731_s1] ss:$0 sm:$0xff] (!%p237_p2)  ;;  %v609_v14 = vld [vmem:[%s735_s5 + $0x28] sm:$0xff] (!%p237_p2)   ;;  %v610_v15 = vld [vmem:[%s735_s5 + $0x30] sm:$0xff] (!%p237_p2)  }
   0x8   : > { %566 = vmatprep.subr.bf16.mxu0 (!%p237_p2), %v620_v1  ;;  %588 = vmatprep.mubr.msk.bf16.mxu1 (!%p237_p2), %vm621_vm0, %v620_v1  ;;  %v536_v6 = vld [vmem:[%s732_s2] ss:$0 sm:$0xff] (!%p237_p2)  ;;  %v611_v16 = vld [vmem:[%s735_s5 + $0x38] sm:$0xff] (!%p237_p2)  }
   0x9   : > { %573 = vmatpush3.bf16.msra.mxu1 (!%p237_p2), %v604_v3  ;;  %v608_v13 = vld [vmem:[%s735_s5 + $0x20] sm:$0xff] (!%p237_p2)  }
   0xa   : > { %574 = vmatprep.subr.bf16.mxu1 (!%p237_p2), %v620_v1  ;;  %v537_v17 = vld [vmem:[%s734_s4] ss:$0 sm:$0xff] (!%p237_p2) }
   0xb   : > { %567 = vmatpush3.bf16.msra.mxu0 (!%p237_p2), %v603_v2  ;;  %v541_v25 = vld [vmem:[%s736_s6] ss:$0 sm:$0xff] (!%p237_p2) }
   0xd   : > { %s739_s25 = smov (!%p266_p3, %s528_s25), 1  ;;  %575 = vmatpush3.bf16.msra.mxu1 %v605_v5 }
   0xe   : > { %s533_s13 = sshll.u32 %s739_s25, 3  ;;  %576 = vmatprep.subr.bf16.mxu1 %v620_v1 }
   0xf   : > { %s269_s16 = scalar_lea.vmem %s730_s0, %s533_s13  ;;  %s273_s17 = scalar_lea.vmem %s737_s7, %s533_s13 }
  0x10   : > { %v275_v7 = vld [vmem:[%s269_s16] sm:$0xff] }
  0x11   : > { %v283_v8 = vmul.f32 %v535_v4, %v275_v7  ;;  %577 = vmatpush3.bf16.msra.mxu1 %v606_v9 }
  0x12   : > { %578 = vmatprep.subr.bf16.mxu1 %v620_v1 }
  0x13   : > { %v291_v10 = vadd.f32 %v536_v6, %v283_v8 }
  0x15   : > { %v292_v11 = vpack.c.bf16 %v291_v10, %v291_v10  ;;  %579 = vmatpush3.bf16.msra.mxu1 %v607_v12 }
  0x16   : > { %580 = vmatprep.subr.bf16.mxu1 %v620_v1 }
  0x17   : > { %569 = vmatmul.mubr.msk.bf16.vlgmr.msra.gmra.mrb[0].mxu0 %vm316_vm1, %v292_v11 }
  0x19   : > { %581 = vmatpush3.bf16.msra.mxu1 %v608_v13 }
  0x1a   : > { %582 = vmatprep.subr.bf16.mxu1 %v620_v1 }
  0x1d   : > { %583 = vmatpush3.bf16.msra.mxu1 %v609_v14 }
  0x1e   : > { %584 = vmatprep.subr.bf16.mxu1 %v620_v1 }
  0x21   : > { %585 = vmatpush3.bf16.msra.mxu1 %v610_v15 }
  0x22   : > { %586 = vmatprep.subr.bf16.mxu1 %v620_v1 }
  0x25   : > { %587 = vmatpush3.bf16.msra.mxu1 %v611_v16 }
  0xea   : > { %v354_v18 = vpop.f32.mrb[0].mxu0 }
  0xeb   : > { %v355_v19 = vadd.f32 %v537_v17, %v354_v18  ;;  %v570_v20 = vpop.f32.mrb[1].mxu0 }
  0xec   : > { %v357_v21 = vpop.f32.mrb[2].mxu0 }
  0xed   : > { %v360_v22 = vmax.f32 %v355_v19, 0.0  ;;  %v571_v23 = vpop.f32.mrb[3].mxu0 }
  0xef   : > { %v361_v24 = vpack.c.bf16 %v360_v22, %v360_v22 }
  0xf1   : > { %589 = vmatmul.mubr.bf16.vlgmr.msra.gmra.mrb[0].mxu1 %v361_v24 }
 0x1c4   : > { %v467_v26 = vpop.f32.mrb[0].mxu1 }
 0x1c5   : > { %v468_v27 = vadd.f32 %v541_v25, %v467_v26  ;;  %v590_v28 = vpop.f32.mrb[1].mxu1 }
 0x1c6   : > { %v470_v29 = vpop.f32.mrb[2].mxu1 }
 0x1c7   : > { %v473_v30 = vadd.f32 %v468_v27, %v291_v10  ;;  %v591_v31 = vpop.f32.mrb[3].mxu1 }
 0x1c9   : > { %474 = vst.msk [vmem:[%s273_s17] sm:$0xff] %vm316_vm1, %v473_v30 }
 0x1ca PF: > { %s17_s24 = sadd.s32 1, %s618_s24  }
 0x1cb   : > { %p14_p4 = scmp.ge.s32.totalorder %s17_s24, 4  }
 0x1cd   :  { %16 = sbr.rel (!%p14_p4) target bundleno = 1 (0x1), region = 78 }

// kernel: mha_encoder.4
= control target key start
LH: loop header
LB: loop body
LE: loop exit
PB: predicated region body
PF: predicated region fallthrough
CT: control target
= control target key end

     0   :  { %s1319_s27 = smov 0   ;;  %s1460_s0 = inlined_call_operand.vmem [shape: f32[2,8,32], index: 0, kind: input, shape index: {}]   ;;  %s1461_s1 = inlined_call_operand.vmem [shape: f32[1,32], index: 1, kind: input, shape index: {}]   ;;  %s1462_s2 = inlined_call_operand.vmem [shape: f32[1,32], index: 2, kind: input, shape index: {}]   ;;  %s1463_s3 = inlined_call_operand.vmem [shape: bf16[32,32], index: 3, kind: input, shape index: {}]   ;;  %s1464_s4 = inlined_call_operand.vmem [shape: bf16[32,32], index: 4, kind: input, shape index: {}]   ;;  %s1465_s5 = inlined_call_operand.vmem [shape: bf16[32,32], index: 5, kind: input, shape index: {}]   ;;  %s1466_s6 = inlined_call_operand.vmem [shape: bf16[32,32], index: 6, kind: input, shape index: {}]   ;;  %s1467_s7 = inlined_call_operand.vmem [shape: f32[1,32], index: 7, kind: input, shape index: {}]   ;;  %s1468_s8 = inlined_call_operand.vmem [shape: f32[2,8,32], index: 8, kind: output, shape index: {}]  }
   0x1 LB: > { %s1078_s28 = sadd.s32 4294967295, %s1264_s27   ;;  %p1082_p0 = scmp.ge.s32.totalorder %s1264_s27, 1  ;;  %s1264_s27 = sphi %s1319_s27, %s18_s27  }
   0x2   : > { %p261_p1 = scmp.lt.s32.totalorder %s1264_s27, 3 }
   0x4   : > { %p262_p2 = pnand %p1082_p0, %p261_p1 }
   0x5   : > { %v1234_v0 = vld [vmem:[%s1464_s4] sm:$0xff] (!%p262_p2)   ;;  %v1266_v1 = vmov (!%p262_p2), 0.0   ;;  %v1236_v3 = vld [vmem:[%s1464_s4 + $0x8] sm:$0xff] (!%p262_p2)   ;;  %vm1267_vm0 = vmmov (!%p262_p2), 0   ;;  %p293_p3 = scmp.lt.s32.totalorder (!%p262_p2), %s1078_s28, 1  ;;  %vm336_vm1 = vcmask (!%p262_p2), 261120  }
   0x6   : > { %265 = sbr.rel (%p262_p2) target bundleno = 1454 (0x5ae), region = 52  ;;  %1146 = vmatprep.subr.bf16.mxu1 (!%p262_p2), %v1266_v1  ;;  %1138 = vmatprep.subr.bf16.mxu0 (!%p262_p2), %v1266_v1  ;;  %v1235_v2 = vld [vmem:[%s1463_s3] sm:$0xff] (!%p262_p2)   ;;  %v1237_v4 = vld [vmem:[%s1463_s3 + $0x8] sm:$0xff] (!%p262_p2)   ;;  %vm494_vm2 = vcmask (!%p262_p2), 64512   ;;  %s1268_s23 = smov (!%p262_p2), 112   ;;  %vm558_vm3 = vcmask (!%p262_p2), 1043456  }
   0x7   : > { %1147 = vmatpush3.bf16.msra.mxu1 (!%p262_p2), %v1234_v0  ;;  %1150 = vmatprep.mubr.msk.bf16.mxu1 (!%p262_p2), %vm1267_vm0, %v1266_v1  ;;  %v1085_v5 = vld [vmem:[%s1461_s1] ss:$0 sm:$0xff] (!%p262_p2)  ;;  %s1269_s24 = smov (!%p262_p2), 120   ;;  %s1270_s25 = smov (!%p262_p2), 104   ;;  %v1239_v23 = vld [vmem:[%s1465_s5 + $0x8] sm:$0xff] (!%p262_p2)   ;;  %vm951_vm4 = vcmask (!%p262_p2), 130048  }
   0x8   : > { %1148 = vmatprep.subr.bf16.mxu1 (!%p262_p2), %v1266_v1  ;;  %1139 = vmatpush3.bf16.msra.mxu0 (!%p262_p2), %v1235_v2  ;;  %v1086_v7 = vld [vmem:[%s1462_s2] ss:$0 sm:$0xff] (!%p262_p2)  ;;  %s1271_s12 = smov (!%p262_p2), 8   ;;  %s1272_s15 = smov (!%p262_p2), 16   ;;  %vm953_vm5 = vcmask (!%p262_p2), 195584  }
   0x9   : > { %1140 = vmatprep.subr.bf16.mxu0 (!%p262_p2), %v1266_v1  ;;  %1142 = vmatprep.mubr.msk.bf16.mxu0 (!%p262_p2), %vm1267_vm0, %v1266_v1  ;;  %v1238_v22 = vld [vmem:[%s1465_s5] sm:$0xff] (!%p262_p2)   ;;  %s1273_s16 = smov (!%p262_p2), 24  }
   0xb   : > { %1149 = vmatpush3.bf16.msra.mxu1 (!%p262_p2), %v1236_v3 }
   0xc   : > { %1141 = vmatpush3.bf16.msra.mxu0 (!%p262_p2), %v1237_v4  ;;  %1162 = vmatprep.subr.bf16.mxu1 (!%p262_p2), %v1266_v1 }
   0xd   : > { %s1470_s28 = smov (!%p293_p3, %s1078_s28), 1  ;;  %1154 = vmatprep.subr.bf16.mxu0 %v1266_v1 }
   0xe   : > { %s1083_s17 = sshll.u32 %s1470_s28, 3 }
   0xf   : > { %s296_s20 = scalar_lea.vmem %s1460_s0, %s1083_s17  ;;  %s300_s22 = scalar_lea.vmem %s1468_s8, %s1083_s17 }
  0x10   : > { %v302_v6 = vld [vmem:[%s296_s20] sm:$0xff] }
  0x11   : > { %v311_v8 = vmul.f32 %v1085_v5, %v302_v6 }
  0x13   : > { %v1363_v9 = vadd.f32 %v1086_v7, %v311_v8 }
  0x15   : > { %v319_v10 = vpack.c.bf16 %v1363_v9, %v1363_v9 }
  0x17   : > { %1151 = vmatmul.mubr.msk.bf16.vlgmr.msra.gmra.mrb[0].mxu1 %vm336_vm1, %v319_v10  ;;  %1143 = vmatmul.mubr.msk.bf16.vlgmr.msra.gmra.mrb[0].mxu0 %vm336_vm1, %v319_v10 }
  0x18   : > { %1164 = vmatprep.mubr.msk.bf16.mxu1 %vm1267_vm0, %v1266_v1  ;;  %1158 = vmatprep.mubr.msk.bf16.mxu0 %vm1267_vm0, %v1266_v1 }
  0x19   : > { %1155 = vmatpush3.bf16.msra.mxu0 %v1238_v22 }
  0x1a   : > { %1156 = vmatprep.subr.bf16.mxu0 %v1266_v1 }
  0x1d   : > { %1157 = vmatpush3.bf16.msra.mxu0 %v1239_v23 }
  0x1e   : > { %1168 = vmatprep.subr.bf16.mxu0 %v1266_v1 }
  0x20   : > { %1159 = vmatmul.mubr.msk.bf16.vlgmr.msra.gmra.mrb[4].mxu0 %vm336_vm1, %v319_v10 }
  0x21   : > { %1170 = vmatprep.mubr.msk.bf16.mxu0 %vm1267_vm0, %v1266_v1 }
  0xea   : > { %v430_v11 = vpop.f32.mrb[0].mxu1  ;;  %v374_v12 = vpop.f32.mrb[0].mxu0 }
  0xeb   : > { %v493_v13 = vpack.c.bf16 %v430_v11, %v430_v11  ;;  %v1152_v14 = vpop.f32.mrb[1].mxu1  ;;  %v1144_v15 = vpop.f32.mrb[1].mxu0  ;;  %v492_v19 = vpack.c.bf16 %v374_v12, %v374_v12 }
  0xec   : > { %v433_v16 = vpop.f32.mrb[2].mxu1  ;;  %v377_v17 = vpop.f32.mrb[2].mxu0 }
  0xed   : > { %718 = vrot.lane.b32.xlu1 %v493_v13, %s1268_s23  ;;  %606 = vrot.lane.b32.xlu0 %v493_v13, %s1269_s24  ;;  %v1153_v18 = vpop.f32.mrb[3].mxu1  ;;  %v499_v20 = vsel %vm494_vm2, %v493_v13, 0  ;;  %v1145_v21 = vpop.f32.mrb[3].mxu0 }
  0xee   : > { %1163 = vmatpush3.bf16.xpose.msra.mxu1 %v499_v20 }
  0xef   : > { %1174 = vmatprep.subr.bf16.mxu1 %v1266_v1 }
  0xf1   : > { %716 = vrot.lane.b32.xlu1 %v492_v19, %s1268_s23  ;;  %603 = vrot.lane.b32.xlu0 %v492_v19, %s1269_s24 }
  0xf3   : > { %v486_v39 = vpop.f32.mrb[4].mxu0 }
  0xf4   : > { %v554_v40 = vpack.c.bf16 %v486_v39, %v486_v39  ;;  %v1160_v41 = vpop.f32.mrb[5].mxu0 }
  0xf5   : > { %827 = vrot.lane.b32.xlu1 %v492_v19, %s1270_s25  ;;  %829 = vrot.lane.b32.xlu0 %v493_v13, %s1270_s25  ;;  %v489_v42 = vpop.f32.mrb[6].mxu0 }
  0xf6   : > { %1165 = vmatmul.mubr.msk.bf16.vlgmr.msra.gmra.mrb[4].mxu1 %vm494_vm2, %v492_v19  ;;  %v1161_v43 = vpop.f32.mrb[7].mxu0  ;;  %v560_v44 = vsel %vm558_vm3, %v554_v40, 0 }
  0xf7   : > { %1176 = vmatprep.mubr.msk.bf16.mxu1 %vm1267_vm0, %v1266_v1  ;;  %1169 = vmatpush3.bf16.msra.mxu0 %v560_v44 }
  0xf8   : > { %1180 = vmatprep.subr.bf16.mxu0 %v1266_v1 }
 0x15f   : > { %v607_v24 = vpop.permute.xlu0 %606  ;;  %v719_v26 = vpop.permute.xlu1 %718 }
 0x160   : > { %v612_v25 = vsel %vm494_vm2, %v607_v24, 0  ;;  %v724_v28 = vsel %vm494_vm2, %v719_v26, 0 }
 0x161   : > { %1175 = vmatpush3.bf16.xpose.msra.mxu1 %v612_v25 }
 0x162   : > { %1186 = vmatprep.subr.bf16.mxu1 %v1266_v1 }
 0x163   : > { %v604_v27 = vpop.permute.xlu0 %603  ;;  %v717_v30 = vpop.permute.xlu1 %716 }
 0x167   : > { %v830_v29 = vpop.permute.xlu0 %829  ;;  %v828_v32 = vpop.permute.xlu1 %827 }
 0x168   : > { %1177 = vmatmul.mubr.msk.bf16.vlgmr.msra.gmra.mrb[8].mxu1 %vm494_vm2, %v604_v27  ;;  %v835_v31 = vsel %vm494_vm2, %v830_v29, 0 }
 0x169   : > { %1187 = vmatpush3.bf16.xpose.msra.mxu1 %v724_v28  ;;  %1188 = vmatprep.mubr.msk.bf16.mxu1 %vm1267_vm0, %v1266_v1 }
 0x16a   : > { %1198 = vmatprep.subr.bf16.mxu1 %v1266_v1 }
 0x170   : > { %1189 = vmatmul.mubr.msk.bf16.vlgmr.msra.gmra.mrb[12].mxu1 %vm494_vm2, %v717_v30 }
 0x171   : > { %1199 = vmatpush3.bf16.xpose.msra.mxu1 %v835_v31  ;;  %1200 = vmatprep.mubr.msk.bf16.mxu1 %vm1267_vm0, %v1266_v1 }
 0x172   : > { %1210 = vmatprep.subr.bf16.mxu1 %v1266_v1 }
 0x178   : > { %1201 = vmatmul.mubr.msk.bf16.vlgmr.msra.gmra.mrb[16].mxu1 %vm494_vm2, %v828_v32 }
 0x179   : > { %1214 = vmatprep.mubr.msk.bf16.mxu1 %vm1267_vm0, %v1266_v1 }
 0x1c9   : > { %v535_v33 = vpop.f32.mrb[4].mxu1 }
 0x1ca   : > { %v541_v34 = vmul.f32 0.35355338, %v535_v33  ;;  %v1166_v35 = vpop.f32.mrb[5].mxu1 }
 0x1cb   : > { %v538_v36 = vpop.f32.mrb[6].mxu1 }
 0x1cc   : > { %v1167_v37 = vpop.f32.mrb[7].mxu1  ;;  %v542_v38 = vsel %vm494_vm2, %v541_v34, -inf }
 0x1cd   : > { %543 = vmax.xlane.f32.xlu0 %v542_v38 }
 0x23b   : > { %v648_v45 = vpop.f32.mrb[8].mxu1 }
 0x23c   : > { %v654_v46 = vmul.f32 0.35355338, %v648_v45  ;;  %v1178_v47 = vpop.f32.mrb[9].mxu1 }
 0x23d   : > { %v651_v48 = vpop.f32.mrb[10].mxu1  ;;  %v1240_v47 = vld [vmem:[%s1466_s6] sm:$0xff]  }
 0x23e   : > { %v1179_v49 = vpop.f32.mrb[11].mxu1  ;;  %v655_v50 = vsel %vm494_vm2, %v654_v46, -inf  ;;  %1211 = vmatpush3.bf16.msra.mxu1 %v1240_v47 }
 0x23f   : > { %656 = vmax.xlane.f32.xlu1 %v655_v50  ;;  %1212 = vmatprep.subr.bf16.mxu1 %v1266_v1 }
 0x243   : > { %v760_v51 = vpop.f32.mrb[12].mxu1 }
 0x244   : > { %v766_v52 = vmul.f32 0.35355338, %v760_v51  ;;  %v1190_v53 = vpop.f32.mrb[13].mxu1 }
 0x245   : > { %v763_v54 = vpop.f32.mrb[14].mxu1 }
 0x246   : > { %v1191_v55 = vpop.f32.mrb[15].mxu1  ;;  %v767_v56 = vsel %vm494_vm2, %v766_v52, -inf }
 0x247   : > { %768 = vmax.xlane.f32.xlu0 %v767_v56 }
 0x24b   : > { %v871_v57 = vpop.f32.mrb[16].mxu1 }
 0x24c   : > { %v877_v58 = vmul.f32 0.35355338, %v871_v57  ;;  %v1202_v59 = vpop.f32.mrb[17].mxu1 }
 0x24d   : > { %v874_v60 = vpop.f32.mrb[18].mxu1 }
 0x24e   : > { %v1203_v61 = vpop.f32.mrb[19].mxu1  ;;  %v878_v62 = vsel %vm494_vm2, %v877_v58, -inf }
 0x24f   : > { %879 = vmax.xlane.f32.xlu0 %v878_v62 }
 0x25a   : > { %v544_v63 = vpop.xlane.xlu0 %543 }
 0x25b   : > { %v545_v0 = vsub.f32 %v541_v34, %v544_v63 }
 0x25d   : > { %v546_v2 = vmul.f32 1.442695, %v545_v0 }
 0x25f   : > { %1242 = vpow2.f32 %v546_v2 }
 0x269   : > { %v1243_v3 = vpop.eup %1242 }
 0x26a   : > { %v548_v4 = vsel %vm494_vm2, %v1243_v3, 0.0 }
 0x26b   : > { %549 = vadd.xlane.f32.xlu1 %v548_v4 }
 0x27c   : > { %668 = vrot.lane.b32.xlu1 %v554_v40, %s1269_s24 }
 0x2cc   : > { %v657_v5 = vpop.xlane.xlu1 %656 }
 0x2cd   : > { %v658_v6 = vsub.f32 %v654_v46, %v657_v5  ;;  %v1107_v5 = vld [vmem:[%s1467_s7] ss:$0 sm:$0xff] }
 0x2cf   : > { %v659_v7 = vmul.f32 1.442695, %v658_v6 }
 0x2d1   : > { %1244 = vpow2.f32 %v659_v7 }
 0x2d4   : > { %v769_v8 = vpop.xlane.xlu0 %768 }
 0x2d5   : > { %v770_v10 = vsub.f32 %v766_v52, %v769_v8  ;;  %v1241_v52 = vld [vmem:[%s1466_s6 + $0x8] sm:$0xff]  }
 0x2d6   : > { %1213 = vmatpush3.bf16.msra.mxu1 %v1241_v52 }
 0x2d7   : > { %v771_v11 = vmul.f32 1.442695, %v770_v10 }
 0x2d9   : > { %1246 = vpow2.f32 %v771_v11 }
 0x2db   : > { %v1245_v12 = vpop.eup %1244 }
 0x2dc   : > { %v880_v13 = vpop.xlane.xlu0 %879  ;;  %v661_v14 = vsel %vm494_vm2, %v1245_v12, 0.0 }
 0x2dd   : > { %v881_v15 = vsub.f32 %v877_v58, %v880_v13  ;;  %662 = vadd.xlane.f32.xlu0 %v661_v14 }
 0x2df   : > { %v882_v16 = vmul.f32 1.442695, %v881_v15 }
 0x2e1   : > { %1248 = vpow2.f32 %v882_v16 }
 0x2e3   : > { %v1247_v17 = vpop.eup %1246 }
 0x2e4   : > { %v773_v18 = vsel %vm494_vm2, %v1247_v17, 0.0 }
 0x2e5   : > { %774 = vadd.xlane.f32.xlu1 %v773_v18 }
 0x2eb   : > { %v1249_v19 = vpop.eup %1248 }
 0x2ec   : > { %v884_v20 = vsel %vm494_vm2, %v1249_v19, 0.0 }
 0x2ed   : > { %885 = vadd.xlane.f32.xlu0 %v884_v20 }
 0x2f6   : > { %890 = vrot.lane.b32.xlu1 %v554_v40, %s1270_s25 }
 0x2f8   : > { %v550_v21 = vpop.xlane.xlu1 %549 }
 0x2f9   : > { %1250 = vrcp.f32 %v550_v21 }
 0x2fc   : > { %v669_v23 = vpop.permute.xlu1 %668 }
 0x2fd   : > { %v674_v26 = vsel %vm558_vm3, %v669_v23, 0 }
 0x303   : > { %v1251_v22 = vpop.eup %1250  ;;  %779 = vrot.lane.b32.xlu0 %v554_v40, %s1268_s23 }
 0x304   : > { %v552_v24 = vmul.f32 %v1251_v22, %v1243_v3 }
 0x306   : > { %v553_v25 = vpack.c.bf16 %v552_v24, %v552_v24 }
 0x308   : > { %1171 = vmatmul.mubr.msk.bf16.vlgmr.msra.gmra.mrb[8].mxu0 %vm494_vm2, %v553_v25 }
 0x309   : > { %1181 = vmatpush3.bf16.msra.mxu0 %v674_v26  ;;  %1182 = vmatprep.mubr.msk.bf16.mxu0 %vm1267_vm0, %v1266_v1 }
 0x30a   : > { %1192 = vmatprep.subr.bf16.mxu0 %v1266_v1 }
 0x36a   : > { %v663_v27 = vpop.xlane.xlu0 %662 }
 0x36b   : > { %1252 = vrcp.f32 %v663_v27 }
 0x372   : > { %v775_v28 = vpop.xlane.xlu1 %774 }
 0x373   : > { %1254 = vrcp.f32 %v775_v28 }
 0x375   : > { %v1253_v29 = vpop.eup %1252 }
 0x376   : > { %v665_v30 = vmul.f32 %v1253_v29, %v1245_v12  ;;  %v891_v37 = vpop.permute.xlu1 %890 }
 0x377   : > { %v896_v39 = vsel %vm558_vm3, %v891_v37, 0 }
 0x378   : > { %v666_v31 = vpack.c.bf16 %v665_v30, %v665_v30 }
 0x37a   : > { %v886_v32 = vpop.xlane.xlu0 %885  ;;  %1183 = vmatmul.mubr.msk.bf16.vlgmr.msra.gmra.mrb[12].mxu0 %vm494_vm2, %v666_v31 }
 0x37b   : > { %1256 = vrcp.f32 %v886_v32  ;;  %1194 = vmatprep.mubr.msk.bf16.mxu0 %vm1267_vm0, %v1266_v1 }
 0x37d   : > { %v1255_v33 = vpop.eup %1254 }
 0x37e   : > { %v777_v34 = vmul.f32 %v1255_v33, %v1247_v17  ;;  %v780_v35 = vpop.permute.xlu0 %779 }
 0x37f   : > { %v785_v36 = vsel %vm558_vm3, %v780_v35, 0 }
 0x380   : > { %1193 = vmatpush3.bf16.msra.mxu0 %v785_v36  ;;  %v778_v38 = vpack.c.bf16 %v777_v34, %v777_v34 }
 0x381   : > { %1204 = vmatprep.subr.bf16.mxu0 %v1266_v1 }
 0x383   : > { %1195 = vmatmul.mubr.msk.bf16.vlgmr.msra.gmra.mrb[16].mxu0 %vm494_vm2, %v778_v38 }
 0x384   : > { %1205 = vmatpush3.bf16.msra.mxu0 %v896_v39  ;;  %1206 = vmatprep.mubr.msk.bf16.mxu0 %vm1267_vm0, %v1266_v1 }
 0x385   : > { %v1257_v40 = vpop.eup %1256 }
 0x386   : > { %v888_v41 = vmul.f32 %v1257_v40, %v1249_v19 }
 0x388   : > { %v889_v42 = vpack.c.bf16 %v888_v41, %v888_v41 }
 0x38b   : > { %1207 = vmatmul.mubr.msk.bf16.vlgmr.msra.gmra.mrb[20].mxu0 %vm494_vm2, %v889_v42 }
 0x3db   : > { %v596_v43 = vpop.f32.mrb[8].mxu0 }
 0x3dc   : > { %v1172_v44 = vpop.f32.mrb[9].mxu0 }
 0x3dd   : > { %v599_v45 = vpop.f32.mrb[10].mxu0 }
 0x3de   : > { %v1173_v46 = vpop.f32.mrb[11].mxu0 }
 0x44d   : > { %v710_v48 = vpop.f32.mrb[12].mxu0 }
 0x44e   : > { %939 = vrot.lane.b32.xlu1 %v710_v48, %s1271_s12  ;;  %v1184_v49 = vpop.f32.mrb[13].mxu0 }
 0x44f   : > { %v713_v50 = vpop.f32.mrb[14].mxu0 }
 0x450   : > { %v1185_v51 = vpop.f32.mrb[15].mxu0 }
 0x456   : > { %v821_v53 = vpop.f32.mrb[16].mxu0 }
 0x457   : > { %943 = vrot.lane.b32.xlu0 %v821_v53, %s1272_s15  ;;  %v1196_v54 = vpop.f32.mrb[17].mxu0 }
 0x458   : > { %v824_v55 = vpop.f32.mrb[18].mxu0 }
 0x459   : > { %v1197_v56 = vpop.f32.mrb[19].mxu0 }
 0x45e   : > { %v932_v57 = vpop.f32.mrb[20].mxu0 }
 0x45f   : > { %947 = vrot.lane.b32.xlu1 %v932_v57, %s1273_s16  ;;  %v1208_v1 = vpop.f32.mrb[21].mxu0 }
 0x460   : > { %v935_v58 = vpop.f32.mrb[22].mxu0 }
 0x461   : > { %v1209_v59 = vpop.f32.mrb[23].mxu0 }
 0x4c0   : > { %v940_v60 = vpop.permute.xlu1 %939 }
 0x4c1   : > { %v950_v62 = vsel %vm494_vm2, %v596_v43, %v940_v60 }
 0x4c9   : > { %v944_v61 = vpop.permute.xlu0 %943 }
 0x4ca   : > { %v952_v63 = vsel %vm951_vm4, %v950_v62, %v944_v61 }
 0x4d1   : > { %v948_v0 = vpop.permute.xlu1 %947 }
 0x4d2   : > { %v954_v2 = vsel %vm953_vm5, %v952_v63, %v948_v0 }
 0x4d3   : > { %v955_v3 = vpack.c.bf16 %v954_v2, %v954_v2 }
 0x4d5   : > { %1215 = vmatmul.mubr.msk.bf16.vlgmr.msra.gmra.mrb[20].mxu1 %vm336_vm1, %v955_v3 }
 0x5a8   : > { %v1009_v4 = vpop.f32.mrb[20].mxu1 }
 0x5a9   : > { %v1015_v6 = vadd.f32 %v1009_v4, %v1363_v9  ;;  %v1216_v7 = vpop.f32.mrb[21].mxu1 }
 0x5aa   : > { %v1012_v8 = vpop.f32.mrb[22].mxu1 }
 0x5ab   : > { %v1023_v10 = vadd.f32 %v1107_v5, %v1015_v6  ;;  %v1217_v11 = vpop.f32.mrb[23].mxu1 }
 0x5ad   : > { %1024 = vst.msk [vmem:[%s300_s22] sm:$0xff] %vm336_vm1, %v1023_v10 }
 0x5ae PF: > { %s18_s27 = sadd.s32 1, %s1264_s27  }
 0x5af   : > { %p15_p4 = scmp.ge.s32.totalorder %s18_s27, 4  }
 0x5b1   :  { %17 = sbr.rel (!%p15_p4) target bundleno = 1 (0x1), region = 82 }

</bundles_post_ra>
